<compile_context>
chip_gen: v5e
topology: v5e:2x2
jax: 0.10.0
libtpu: 0.0.40
codegen_flags: <defaults>
</compile_context>

<pallas_src>
import jax
import jax.numpy as jnp
from jax.experimental import pallas as pl
from jax.experimental.pallas import tpu as pltpu

# Set to jnp.bfloat16 for ~2x MXU throughput in production (accumulation stays f32);
# kept f32 here so the numerical check against the XLA reference is tight.
MATMUL_DTYPE = jnp.float32

_PAD_MODES = {"zero": "constant", "reflect": "reflect", "replicate": "edge"}


def l2normalize(v, eps=1e-12):
    return v / (jnp.linalg.norm(v) + eps)


def spectral_normalize(w_oihw, u):
    # One power iteration, exactly like SpectralNorm._update_u_v (power_iterations=1).
    height = w_oihw.shape[0]
    wmat = w_oihw.reshape(height, -1)
    v = l2normalize(wmat.T @ u)
    u2 = l2normalize(wmat @ v)
    sigma = jnp.dot(u2, wmat @ v)
    return w_oihw / sigma


def _apply_activation(y, activation):
    if activation == "lrelu":
        return jnp.where(y >= 0.0, y, 0.2 * y)
    if activation == "relu":
        return jnp.maximum(y, 0.0)
    if activation == "tanh":
        return jnp.tanh(y)
    if activation in ("none", None):
        return y
    # TODO(synk): 'prelu'/'selu' activations of Conv2dBlock are not implemented.
    raise NotImplementedError(f"activation {activation!r}")


def _pick_row_tile(Ho, need_mult8):
    # Whole image per grid step when small; else the largest divisor of Ho <= 64
    # (multiple of 8 when the fused-projection output block requires it).
    if Ho <= 64:
        return Ho
    for t in range(64, 0, -1):
        if Ho % t == 0 and (not need_mult8 or t % 8 == 0):
            return t
    return Ho


# ---------------------------------------------------------------------------
# Pallas kernel: fused Conv2dBlock (pad + 4x4/s2 conv + bias + activation),
# optionally fused with the trailing 1x1 Conv2d -> 1 logit channel.
# ---------------------------------------------------------------------------
def conv4x4s2_block(x, w_hwio, bias, *, activation, pad_type, proj=None):
    N, H, W, Cin = x.shape
    assert H % 2 == 0 and W % 2 == 0, "spatial dims must be even for the stride-2 conv"
    KH, KW, Cin_w, Cout = w_hwio.shape
    assert (KH, KW, Cin_w) == (4, 4, Cin)
    Ho, Wo = H // 2, W // 2

    xp = jnp.pad(x, ((0, 0), (1, 1), (1, 1), (0, 0)), mode=_PAD_MODES[pad_type])
    # Polyphase space-to-depth: x2[n, y, x, (p, q, c)] = xp[n, 2y + p, 2x + q, c]
    x2 = xp.reshape(N, Ho + 1, 2, Wo + 1, 2, Cin)
    x2 = x2.transpose(0, 1, 3, 2, 4, 5).reshape(N, Ho + 1, Wo + 1, 4 * Cin)
    x2 = x2.astype(jnp.float32)

    # w2[2a + b, (p, q, c), o] = w[2a + p, 2b + q, c, o]
    w2 = w_hwio.astype(jnp.float32).reshape(2, 2, 2, 2, Cin, Cout)
    w2 = w2.transpose(0, 2, 1, 3, 4, 5).reshape(4, 4 * Cin, Cout)
    b2 = bias.astype(jnp.float32).reshape(1, Cout)

    has_proj = proj is not None
    if has_proj:
        wp, bp = proj
        wp2 = wp.astype(jnp.float32).reshape(1, Cout)
        bp2 = jnp.asarray(bp, jnp.float32).reshape(1, 1)

    TH = _pick_row_tile(Ho, need_mult8=has_proj)
    grid = (N, Ho // TH)

    def kernel(*refs):
        if has_proj:
            x_ref, w_ref, b_ref, wp_ref, bp_ref, o_ref = refs
        else:
            x_ref, w_ref, b_ref, o_ref = refs
        r0 = pl.program_id(1) * TH
        xv = x_ref[0, pl.ds(r0, TH + 1), :, :]            # (TH+1, Wo+1, 4*Cin)
        acc = jnp.zeros((TH * Wo, Cout), jnp.float32)
        for a in range(2):
            for b in range(2):
                tap = xv[a:a + TH, b:b + Wo, :].reshape(TH * Wo, 4 * Cin)
                acc = acc + jnp.dot(tap.astype(MATMUL_DTYPE),
                                    w_ref[2 * a + b].astype(MATMUL_DTYPE),
                                    preferred_element_type=jnp.float32)
        acc = _apply_activation(acc + b_ref[...], activation)
        y3 = acc.reshape(TH, Wo, Cout)
        if has_proj:
            z = jnp.sum(y3 * wp_ref[...].reshape(1, 1, Cout), axis=-1,
                        keepdims=True) + bp_ref[...]
            o_ref[0] = z.astype(o_ref.dtype)
        else:
            o_ref[0] = y3.astype(o_ref.dtype)

    in_specs = [
        pl.BlockSpec((1, Ho + 1, Wo + 1, 4 * Cin), lambda n, r: (n, 0, 0, 0)),
        pl.BlockSpec((4, 4 * Cin, Cout), lambda n, r: (0, 0, 0)),
        pl.BlockSpec((1, Cout), lambda n, r: (0, 0)),
    ]
    args = [x2, w2, b2]
    if has_proj:
        in_specs += [pl.BlockSpec((1, Cout), lambda n, r: (0, 0)),
                     pl.BlockSpec((1, 1), lambda n, r: (0, 0))]
        args += [wp2, bp2]
        out_ch = 1
        out_shape = jax.ShapeDtypeStruct((N, Ho, Wo, 1), x.dtype)
        out_spec = pl.BlockSpec((1, TH, Wo, 1), lambda n, r: (n, r, 0, 0))
    else:
        out_ch = Cout
        out_shape = jax.ShapeDtypeStruct((N, Ho, Wo, Cout), x.dtype)
        out_spec = pl.BlockSpec((1, TH, Wo, Cout), lambda n, r: (n, r, 0, 0))

    flops = 2 * N * Ho * Wo * (16 * Cin) * Cout
    if has_proj:
        flops += 2 * N * Ho * Wo * Cout
    bytes_accessed = 4 * (int(x2.size) + int(w2.size) + int(b2.size) + N * Ho * Wo * out_ch)

    return pl.pallas_call(
        kernel,
        out_shape=out_shape,
        grid=grid,
        in_specs=in_specs,
        out_specs=out_spec,
        compiler_params=pltpu.CompilerParams(
            dimension_semantics=("parallel", "parallel"),
            vmem_limit_bytes=48 * 1024 * 1024),
        cost_estimate=pl.CostEstimate(flops=int(flops), transcendentals=0,
                                      bytes_accessed=int(bytes_accessed)),
    )(*args)


# ---------------------------------------------------------------------------
# Plain-JAX glue: inter-scale downsample (AvgPool2d, count_include_pad=False)
# ---------------------------------------------------------------------------
def avg_pool_3x3_s2(x_nhwc):
    win, strides = (1, 3, 3, 1), (1, 2, 2, 1)
    pads = ((0, 0), (1, 1), (1, 1), (0, 0))
    s = jax.lax.reduce_window(x_nhwc, 0.0, jax.lax.add, win, strides, pads)
    ones = jnp.ones(x_nhwc.shape[:3] + (1,), x_nhwc.dtype)
    c = jax.lax.reduce_window(ones, 0.0, jax.lax.add, win, strides, pads)
    return s / c


# ---------------------------------------------------------------------------
# Forward pass (shared by the Pallas path and the pure-JAX reference)
# ---------------------------------------------------------------------------
def _run_scale(x_nhwc, scale_params, cfg, conv_fn):
    h = x_nhwc
    n_layer = cfg["n_layer"]
    for i in range(n_layer):
        blk = scale_params["blocks"][i]
        proj = (scale_params["wp"], scale_params["bp"]) if i == n_layer - 1 else None
        h = conv_fn(h, blk["w"], blk["b"], activation=cfg["activ"],
                    pad_type=cfg["pad_type"], proj=proj)
    return jnp.transpose(h, (0, 3, 1, 2))        # (N, 1, Ho, Wo)


def ms_image_dis_forward(x_nchw, params, cfg, conv_fn):
    x = jnp.transpose(x_nchw, (0, 2, 3, 1))      # NCHW -> NHWC
    outs = []
    for s in range(cfg["num_scales"]):
        outs.append(_run_scale(x, params["cnns"][s], cfg, conv_fn))
        if s + 1 < cfg["num_scales"]:
            x = avg_pool_3x3_s2(x)
    return outs


# ---------------------------------------------------------------------------
# Pure-JAX reference conv block (validates the Pallas kernels)
# ---------------------------------------------------------------------------
def ref_conv4x4s2_block(x, w_hwio, bias, *, activation, pad_type, proj=None):
    xp = jnp.pad(x, ((0, 0), (1, 1), (1, 1), (0, 0)), mode=_PAD_MODES[pad_type])
    out = jax.lax.conv_general_dilated(
        xp.astype(jnp.float32), w_hwio.astype(jnp.float32),
        window_strides=(2, 2), padding="VALID",
        dimension_numbers=("NHWC", "HWIO", "NHWC"))
    out = out + bias.reshape(1, 1, 1, -1)
    out = _apply_activation(out, activation)
    if proj is not None:
        wp, bp = proj
        out = jnp.einsum("nhwc,c->nhw", out, wp)[..., None] + bp
    return out.astype(x.dtype)


# ---------------------------------------------------------------------------
# Parameter construction (mirrors MsImageDis._make_net)
# ---------------------------------------------------------------------------
def init_params(key, input_dim, cfg):
    n_layer, dim0 = cfg["n_layer"], cfg["dim"]
    num_scales, norm = cfg["num_scales"], cfg["norm"]
    keys = iter(jax.random.split(key, num_scales * (3 * n_layer + 4)))

    def nrm(shape, scale=0.1):
        return scale * jax.random.normal(next(keys), shape, jnp.float32)

    cnns = []
    for _ in range(num_scales):
        blocks = []
        cin, cout = input_dim, dim0
        for i in range(n_layer):
            layer_norm = "none" if i == 0 else norm     # first block is always norm='none'
            w_oihw = nrm((cout, cin, 4, 4))
            if layer_norm == "sn":
                u = l2normalize(jax.random.normal(next(keys), (cout,), jnp.float32))
                w_oihw = spectral_normalize(w_oihw, u)
            elif layer_norm != "none":
                # TODO(synk): Conv2dBlock norms 'in'/'ln'/'adain'/'batch' are not implemented.
                raise NotImplementedError(f"norm {layer_norm!r}")
            blocks.append({"w": jnp.transpose(w_oihw, (2, 3, 1, 0)),   # OIHW -> HWIO
                           "b": nrm((cout,))})
            cin, cout = cout, cout * 2
        cnns.append({"blocks": blocks,
                     "wp": nrm((cin,)),          # final Conv2d(dim_last, 1, 1) weight
                     "bp": nrm(())})             # ... and bias
    return {"cnns": cnns}


if __name__ == "__main__":
    key = jax.random.PRNGKey(0)
    kx, kp = jax.random.split(key)

    # MsImageDis(input_dim=3, params=dict(n_layer=3, gan_type='lsgan', dim=16,
    #            norm='none', activ='lrelu', num_scales=2, pad_type='reflect'))
    cfg = dict(n_layer=3, dim=16, norm="none", activ="lrelu",
               num_scales=2, pad_type="reflect", gan_type="lsgan")
    input_dim = 3
    N, H, W = 2, 32, 32

    x = jax.random.normal(kx, (N, input_dim, H, W), jnp.float32)
    params = init_params(kp, input_dim, cfg)

    outs = ms_image_dis_forward(x, params, cfg, conv4x4s2_block)
    outs = jax.block_until_ready(outs)

    expected = [(N, 1, 4, 4), (N, 1, 2, 2)]
    got = [tuple(int(d) for d in o.shape) for o in outs]
    assert got == expected, f"output shapes {got} != {expected}"

    refs = ms_image_dis_forward(x, params, cfg, ref_conv4x4s2_block)
    err = max(float(jnp.max(jnp.abs(o - r))) for o, r in zip(outs, refs))
    assert err < 1e-3, f"max abs error vs reference: {err}"

    print("KERNEL_OK")
</pallas_src>

<mosaic_0001>
module attributes {stable_mosaic.version = 11 : i64} {
  func.func @kernel(%arg0: i32, %arg1: i32, %arg2: memref<1x17x17x12xf32, #tpu.memory_space<vmem>>, %arg3: memref<4x12x16xf32, #tpu.memory_space<vmem>>, %arg4: memref<1x16xf32, #tpu.memory_space<vmem>>, %arg5: memref<1x16x16x16xf32, #tpu.memory_space<vmem>>) attributes {dimension_semantics = [#tpu.dimension_semantics<parallel>, #tpu.dimension_semantics<parallel>], iteration_bounds = array<i64: 2, 1>, scalar_prefetch = 0 : i64, scratch_operands = 0 : i64, tpu.core_type = #tpu.core_type<tc>, window_params = [{transform_indices = @transform_0, window_bounds = array<i64: 1, 17, 17, 12>}, {pipeline_mode = #tpu.pipeline_mode<synchronous>, transform_indices = @transform_1, window_bounds = array<i64: 4, 12, 16>}, {pipeline_mode = #tpu.pipeline_mode<synchronous>, transform_indices = @transform_2, window_bounds = array<i64: 1, 16>}, {transform_indices = @transform_3, window_bounds = array<i64: 1, 16, 16, 16>}]} {
    %c16_i32 = arith.constant 16 : i32
    %0 = arith.muli %arg1, %c16_i32 : i32
    %c0 = arith.constant 0 : index
    %1 = arith.index_cast %0 : i32 to index
    %c0_0 = arith.constant 0 : index
    %c0_1 = arith.constant 0 : index
    %2 = vector.load %arg2[%c0, %1, %c0_0, %c0_1] : memref<1x17x17x12xf32, #tpu.memory_space<vmem>>, vector<1x17x17x12xf32>
    %3 = vector.shape_cast %2 : vector<1x17x17x12xf32> to vector<17x17x12xf32>
    %cst = arith.constant 0.000000e+00 : f32
    %4 = vector.broadcast %cst : f32 to vector<256x16xf32>
    %5 = vector.extract_strided_slice %3 {offsets = [0, 0, 0], sizes = [16, 16, 12], strides = [1, 1, 1]} : vector<17x17x12xf32> to vector<16x16x12xf32>
    %6 = vector.shape_cast %5 : vector<16x16x12xf32> to vector<256x12xf32>
    %c0_2 = arith.constant 0 : index
    %c0_3 = arith.constant 0 : index
    %c0_4 = arith.constant 0 : index
    %7 = vector.load %arg3[%c0_2, %c0_3, %c0_4] : memref<4x12x16xf32, #tpu.memory_space<vmem>>, vector<1x12x16xf32>
    %8 = vector.shape_cast %7 : vector<1x12x16xf32> to vector<12x16xf32>
    %cst_5 = arith.constant dense<0.000000e+00> : vector<256x16xf32>
    %9 = tpu.matmul %6, %8, %cst_5 {dimension_numbers = #tpu.dot_dimension_numbers<[1], [0], [0], [1], [0, 0, 1, 1], [], []>} : vector<256x12xf32>, vector<12x16xf32>, vector<256x16xf32> -> vector<256x16xf32>
    %10 = arith.addf %4, %9 : vector<256x16xf32>
    %11 = vector.extract_strided_slice %3 {offsets = [0, 1, 0], sizes = [16, 16, 12], strides = [1, 1, 1]} : vector<17x17x12xf32> to vector<16x16x12xf32>
    %12 = vector.shape_cast %11 : vector<16x16x12xf32> to vector<256x12xf32>
    %c1 = arith.constant 1 : index
    %c0_6 = arith.constant 0 : index
    %c0_7 = arith.constant 0 : index
    %13 = vector.load %arg3[%c1, %c0_6, %c0_7] : memref<4x12x16xf32, #tpu.memory_space<vmem>>, vector<1x12x16xf32>
    %14 = vector.shape_cast %13 : vector<1x12x16xf32> to vector<12x16xf32>
    %cst_8 = arith.constant dense<0.000000e+00> : vector<256x16xf32>
    %15 = tpu.matmul %12, %14, %cst_8 {dimension_numbers = #tpu.dot_dimension_numbers<[1], [0], [0], [1], [0, 0, 1, 1], [], []>} : vector<256x12xf32>, vector<12x16xf32>, vector<256x16xf32> -> vector<256x16xf32>
    %16 = arith.addf %10, %15 : vector<256x16xf32>
    %17 = vector.extract_strided_slice %3 {offsets = [1, 0, 0], sizes = [16, 16, 12], strides = [1, 1, 1]} : vector<17x17x12xf32> to vector<16x16x12xf32>
    %18 = vector.shape_cast %17 : vector<16x16x12xf32> to vector<256x12xf32>
    %c2 = arith.constant 2 : index
    %c0_9 = arith.constant 0 : index
    %c0_10 = arith.constant 0 : index
    %19 = vector.load %arg3[%c2, %c0_9, %c0_10] : memref<4x12x16xf32, #tpu.memory_space<vmem>>, vector<1x12x16xf32>
    %20 = vector.shape_cast %19 : vector<1x12x16xf32> to vector<12x16xf32>
    %cst_11 = arith.constant dense<0.000000e+00> : vector<256x16xf32>
    %21 = tpu.matmul %18, %20, %cst_11 {dimension_numbers = #tpu.dot_dimension_numbers<[1], [0], [0], [1], [0, 0, 1, 1], [], []>} : vector<256x12xf32>, vector<12x16xf32>, vector<256x16xf32> -> vector<256x16xf32>
    %22 = arith.addf %16, %21 : vector<256x16xf32>
    %23 = vector.extract_strided_slice %3 {offsets = [1, 1, 0], sizes = [16, 16, 12], strides = [1, 1, 1]} : vector<17x17x12xf32> to vector<16x16x12xf32>
    %24 = vector.shape_cast %23 : vector<16x16x12xf32> to vector<256x12xf32>
    %c3 = arith.constant 3 : index
    %c0_12 = arith.constant 0 : index
    %c0_13 = arith.constant 0 : index
    %25 = vector.load %arg3[%c3, %c0_12, %c0_13] : memref<4x12x16xf32, #tpu.memory_space<vmem>>, vector<1x12x16xf32>
    %26 = vector.shape_cast %25 : vector<1x12x16xf32> to vector<12x16xf32>
    %cst_14 = arith.constant dense<0.000000e+00> : vector<256x16xf32>
    %27 = tpu.matmul %24, %26, %cst_14 {dimension_numbers = #tpu.dot_dimension_numbers<[1], [0], [0], [1], [0, 0, 1, 1], [], []>} : vector<256x12xf32>, vector<12x16xf32>, vector<256x16xf32> -> vector<256x16xf32>
    %28 = arith.addf %22, %27 : vector<256x16xf32>
    %c0_15 = arith.constant 0 : index
    %c0_16 = arith.constant 0 : index
    %29 = vector.load %arg4[%c0_15, %c0_16] : memref<1x16xf32, #tpu.memory_space<vmem>>, vector<1x16xf32>
    %30 = vector.broadcast %29 : vector<1x16xf32> to vector<256x16xf32>
    %31 = arith.addf %28, %30 : vector<256x16xf32>
    %cst_17 = arith.constant 0.000000e+00 : f32
    %32 = vector.broadcast %cst_17 : f32 to vector<256x16xf32>
    %33 = arith.cmpf oge, %31, %32 : vector<256x16xf32>
    %cst_18 = arith.constant 2.000000e-01 : f32
    %34 = vector.broadcast %cst_18 : f32 to vector<256x16xf32>
    %35 = arith.mulf %34, %31 : vector<256x16xf32>
    %36 = arith.select %33, %31, %35 : vector<256x16xi1>, vector<256x16xf32>
    %37 = vector.shape_cast %36 : vector<256x16xf32> to vector<16x16x16xf32>
    %c0_19 = arith.constant 0 : index
    %c0_20 = arith.constant 0 : index
    %c0_21 = arith.constant 0 : index
    %c0_22 = arith.constant 0 : index
    %38 = vector.load %arg5[%c0_19, %c0_20, %c0_21, %c0_22] : memref<1x16x16x16xf32, #tpu.memory_space<vmem>>, vector<1x16x16x16xf32>
    %39 = vector.shape_cast %38 : vector<1x16x16x16xf32> to vector<16x16x16xf32>
    %40 = vector.shape_cast %37 : vector<16x16x16xf32> to vector<1x16x16x16xf32>
    tpu.vector_store %arg5[%c0_19, %c0_20, %c0_21, %c0_22], %40 {strides = array<i32>} : memref<1x16x16x16xf32, #tpu.memory_space<vmem>>, vector<1x16x16x16xf32>,
    return
  }
  func.func @transform_0(%arg0: i32, %arg1: i32) -> (i32, i32, i32, i32) {
    %c0_i32 = arith.constant 0 : i32
    %c0_i32_0 = arith.constant 0 : i32
    %c0_i32_1 = arith.constant 0 : i32
    %c0_i32_2 = arith.constant 0 : i32
    return %arg0, %c0_i32, %c0_i32_0, %c0_i32_1 : i32, i32, i32, i32
  }
  func.func @transform_1(%arg0: i32, %arg1: i32) -> (i32, i32, i32) {
    %c0_i32 = arith.constant 0 : i32
    %c0_i32_0 = arith.constant 0 : i32
    %c0_i32_1 = arith.constant 0 : i32
    %c0_i32_2 = arith.constant 0 : i32
    return %c0_i32, %c0_i32_0, %c0_i32_1 : i32, i32, i32
  }
  func.func @transform_2(%arg0: i32, %arg1: i32) -> (i32, i32) {
    %c0_i32 = arith.constant 0 : i32
    %c0_i32_0 = arith.constant 0 : i32
    %c0_i32_1 = arith.constant 0 : i32
    return %c0_i32, %c0_i32_0 : i32, i32
  }
  func.func @transform_3(%arg0: i32, %arg1: i32) -> (i32, i32, i32, i32) {
    %c0_i32 = arith.constant 0 : i32
    %c0_i32_0 = arith.constant 0 : i32
    %c0_i32_1 = arith.constant 0 : i32
    return %arg0, %arg1, %c0_i32, %c0_i32_0 : i32, i32, i32, i32
  }
}

</mosaic_0001>

<bundles_post_ra>
// kernel: tpu_custom_call.1
= control target key start
LH: loop header
LB: loop body
LE: loop exit
PB: predicated region body
PF: predicated region fallthrough
CT: control target
= control target key end

     0   :  { %8 = vsyncpa [#allocation3], 0  ;;  %s2102_s0 = inlined_call_operand.vmem [shape: f32[2,17,17,12], index: 0, kind: input, shape index: {}]   ;;  %s2103_s1 = inlined_call_operand.vmem [shape: f32[4,12,16], index: 1, kind: input, shape index: {}]   ;;  %s2104_s2 = inlined_call_operand.vmem [shape: f32[1,16], index: 2, kind: input, shape index: {}]   ;;  %s2105_s3 = inlined_call_operand.hbm [shape: f32[2,16,16,16], index: 3, kind: output, shape index: {}]  }
   0x1   :  { %10 = vsyncpa [#allocation3 + $0x1], 0  ;;  %s1623_s12 = smov 0   ;;  %s1625_s13 = smov 0  }
   0x2   :  { %s1627_s14 = smov 0   ;;  %s1629_s15 = smov 0  }
   0x3   :  { %s1631_s16 = smov 0   ;;  %s1633_s17 = smov 0  }
   0x4 LB: > { %s1311_s18 = sadd.s32 4294967295, %s1599_s17   ;;  %s1312_s19 = sadd.s32 4294967294, %s1599_s17   ;;  %s1599_s17 = sphi %s1633_s17, %s16_s17   ;;  %s1595_s16 = sphi %s1631_s16, %s2112_s16   ;;  %s1591_s15 = sphi %s1629_s15, %s2111_s15   ;;  %s1587_s14 = sphi %s1627_s14, %s2110_s14   ;;  %s1583_s13 = sphi %s1625_s13, %s2109_s13   ;;  %s1579_s12 = sphi %s1623_s12, %s2108_s12  }
   0x5   : > { %s28_s20 = sadd.s32 1, %s1595_s16  ;;  %s105_s21 = sadd.s32 1, %s1587_s14 }
   0x6   : > { %p30_p0 = scmp.ge.s32.totalorder %s28_s20, 2  ;;  %p115_p1 = scmp.ne.s32.totalorder %s1587_s14, %s1583_s13 }
   0x7   : > { %p116_p2 = scmp.eq.s32.totalorder %s1311_s18, 1  ;;  %p121_p3 = scmp.ne.s32.totalorder %s1583_s13, %s1579_s12 }
   0x8   : > { %s2114_s20 = smov (%p30_p0, %s28_s20), 0  ;;  %p122_p5 = scmp.eq.s32.totalorder %s1312_s19, 1 }
   0x9   : > { %p1663_p4 = por %p116_p2, %p115_p1  ;;  %s100_s23 = ssub.s32 %s1595_s16, %s2114_s20 }
   0xa   : > { %p1315_p6 = scmp.ge.s32.totalorder %s1599_s17, 1  ;;  %p103_p7 = scmp.eq.s32.totalorder %s100_s23, 0 }
   0xb   : > { %p1670_p8 = por %p122_p5, %p121_p3  ;;  %p154_p9 = scmp.lt.s32.totalorder %s1599_s17, 3 }
   0xc   : > { %s1676_s25 = scalar_select %p103_p7, %s1587_s14, %s105_s21  }
   0xd   : > { %p155_p10 = pnand %p1315_p6, %p154_p9 }
   0xe   : > { %p178_p11 = scmp.lt.s32.totalorder (!%p155_p10), %s1591_s15, 1  ;;  %s175_s30 = sand.u32 (!%p155_p10), 1, %s1583_s13  }
   0xf   : > { %158 = sbr.rel (%p155_p10) target bundleno = 421 (0x1a5), region = 32  ;;  %s1316_s6 = sshll.u32 (!%p155_p10), %s175_s30, 8 }
  0x10   : > { %s1849_s7 = scalar_lea.vmem (!%p155_p10), [#allocation2], %s1316_s6  ;;  %s1461_s8 = sshll.u32 (!%p155_p10), %s1591_s15, 8 }
  0x11   : > { %s1232_s11 = scalar_lea.hbm (!%p155_p10), %s2105_s3, %s1461_s8  ;;  %s1233_s18 = sshll.u32 (!%p155_p10), %s1849_s7, 4  ;;  %s1234_s18 = int_to_ptr.vmem [resolvable:$true] %s1233_s18 }
  0x12   : > { %s1235_s19 = sshll.u32 (!%p155_p10), %s1232_s11, 4  ;;  %s1541_s28 = scalar_lea.hbm (!%p155_p10), %s2105_s3, 512  ;;  %s1236_s19 = int_to_ptr.hbm [resolvable:$true] %s1235_s19 }
  0x13   : > { %s1535_s21 = sshra.s32 (!%p155_p10), %s1236_s19, 4  ;;  %s1536_s21 = int_to_ptr.hbm [resolvable:$true] %s1535_s21 }
  0x14   : > { %vm437_vm0 = vcmask 1043456   ;;  %v1387_v0 = vld [vmem:[%s2103_s1 + $0x28] sm:$0xf]  ;;  %v1386_v1 = vld [vmem:[%s2103_s1 + $0x20] sm:$0xff]  ;;  %v1422_v2 = vld [vmem:[%s2103_s1 + $0x38] sm:$0xf]  ;;  %p1542_p1 = scmp.lt.s32.totalorder %s1536_s21, %s2105_s3 }
  0x15   : > { %1388 = vmatpush.msk.msra.mxu2 %vm437_vm0, %v1387_v0  ;;  %1423 = vmatpush.msk.msra.mxu3 %vm437_vm0, %v1422_v2  ;;  %v1319_v3 = vld [vmem:[%s2103_s1 + $0x18] sm:$0xf]  ;;  %v239_v4 = vld [vmem:[%s2103_s1 + $0x8] sm:$0xf]  ;;  %v1421_v5 = vld [vmem:[%s2103_s1 + $0x30] sm:$0xff]  ;;  %s179_s23 = scalar_select %p178_p11, %s1591_s15, 1 }
  0x16   : > { %1320 = vmatpush.msk.msra.mxu0 %vm437_vm0, %v1319_v3  ;;  %1353 = vmatpush.msk.msra.mxu1 %vm437_vm0, %v239_v4  ;;  %v1318_v6 = vld [vmem:[%s2103_s1 + $0x10] sm:$0xff]  ;;  %v238_v7 = vld [vmem:[%s2103_s1] sm:$0xff]  ;;  %vm372_vm1 = vcmask 97280   ;;  %vm288_vm2 = vcmask 1046528   ;;  %vm1184_vm4 = vcmask 130048   ;;  %s1218_s15 = scalar_lea.sflag [#allocation3], %s175_s30 }
  0x17   : > { %761 = vmatpush.msra.mxu2 %v1386_v1  ;;  %922 = vmatpush.msra.mxu3 %v1421_v5  ;;  %s1462_s26 = smul.u32 408, %s179_s23  ;;  %s1537_s23 = scalar_lea.hbm %s1536_s21, 256 }
  0x18   : > { %456 = vmatpush.msra.mxu0 %v1318_v6  ;;  %636 = vmatpush.msra.mxu1 %v238_v7  ;;  %p1538_p12 = scmp.ne.s32.totalorder %s1536_s21, %s1537_s23  ;;  %p1543_p2 = scmp.lt.s32.totalorder %s1541_s28, %s1537_s23 }
  0x19   : > { %s1707_s29 = scalar_lea.vmem %s2102_s0, %s1462_s26 }
  0x1a   : > { %v190_v8 = vld [vmem:[%s1707_s29 + $0x18] sm:$0xff]  ;;  %v191_v9 = vld [vmem:[%s1707_s29 + $0x20] sm:$0xff]  ;;  %v188_v13 = vld [vmem:[%s1707_s29 + $0x8] sm:$0xff]  ;;  %p1539_p13 = pnand %p1538_p12, %p1663_p4  ;;  %p1544_p3 = por %p1543_p2, %p1542_p1 }
  0x1b   : > { %v187_v10 = vld [vmem:[%s1707_s29] sm:$0xff]  ;;  %v294_v11 = vrot.slane %v190_v8, 1  ;;  %1389 = vmatmul.msk.f32.vlgmr.msra.gmra.mxu2 %vm372_vm1, %v190_v8  ;;  %v295_v12 = vrot.slane %v191_v9, 1  ;;  %v290_v15 = vrot.slane %v188_v13, 1  ;;  %v192_v16 = vld [vmem:[%s1707_s29 + $0x28] sm:$0x1] }
  0x1c   : > { %v289_v14 = vrot.slane %v187_v10, 1  ;;  %1354 = vmatmul.msk.f32.vlgmr.msra.gmra.mxu1 %vm372_vm1, %v187_v10  ;;  %v189_v18 = vld [vmem:[%s1707_s29 + $0x10] sm:$0x1]  ;;  %v297_v20 = vrot.slane %v192_v16, 1  ;;  %v194_v25 = vld [vmem:[%s1707_s29 + $0x38] sm:$0xff]  ;;  %v196_v32 = vld [vmem:[%s1707_s29 + $0x48] sm:$0xff]  ;;  %p1540_p0 = pneg %p1539_p13 }
  0x1d   : > { %v296_v17 = vsel %vm288_vm2, %v294_v11, %v295_v12  ;;  %v292_v21 = vrot.slane %v189_v18, 1  ;;  %v193_v24 = vld [vmem:[%s1707_s29 + $0x30] sm:$0xff]  ;;  %v300_v27 = vrot.slane %v194_v25, 1  ;;  %v195_v29 = vld [vmem:[%s1707_s29 + $0x40] sm:$0x1]  ;;  %v304_v34 = vrot.slane %v196_v32, 1 }
  0x1e   : > { %1424 = vmatmul.msk.f32.vlgmr.msra.gmra.mxu3 %vm372_vm1, %v296_v17  ;;  %v291_v19 = vsel %vm288_vm2, %v289_v14, %v290_v15  ;;  %v298_v22 = vsel %vm288_vm2, %v295_v12, %v297_v20  ;;  %v299_v26 = vrot.slane %v193_v24, 1  ;;  %v302_v30 = vrot.slane %v195_v29, 1  ;;  %v197_v33 = vld [vmem:[%s1707_s29 + $0x50] sm:$0xff]  ;;  %v198_v37 = vld [vmem:[%s1707_s29 + $0x58] sm:$0x1]  ;;  %v199_v40 = vld [vmem:[%s1707_s29 + $0x60] sm:$0xff]  ;;  %p1545_p5 = pnand %p1544_p3, %p1540_p0 }
  0x1f   : > { %1321 = vmatmul.msk.f32.vlgmr.msra.gmra.mxu0 %vm372_vm1, %v291_v19  ;;  %v293_v23 = vsel %vm288_vm2, %v290_v15, %v292_v21  ;;  %v305_v35 = vrot.slane %v197_v33, 1  ;;  %v307_v38 = vrot.slane %v198_v37, 1  ;;  %v200_v41 = vld [vmem:[%s1707_s29 + $0x68] sm:$0xff]  ;;  %v309_v42 = vrot.slane %v199_v40, 1  ;;  %v201_v45 = vld [vmem:[%s1707_s29 + $0x70] sm:$0x1] }
  0x20   : > { %v301_v28 = vsel %vm288_vm2, %v299_v26, %v300_v27  ;;  %v303_v31 = vsel %vm288_vm2, %v300_v27, %v302_v30  ;;  %v310_v43 = vrot.slane %v200_v41, 1  ;;  %v312_v46 = vrot.slane %v201_v45, 1  ;;  %v202_v48 = vld [vmem:[%s1707_s29 + $0x78] sm:$0xff]  ;;  %v203_v49 = vld [vmem:[%s1707_s29 + $0x80] sm:$0xff]  ;;  %v204_v53 = vld [vmem:[%s1707_s29 + $0x88] sm:$0x1] }
  0x21   : > { %v306_v36 = vsel %vm288_vm2, %v304_v34, %v305_v35  ;;  %v308_v39 = vsel %vm288_vm2, %v305_v35, %v307_v38  ;;  %v314_v50 = vrot.slane %v202_v48, 1  ;;  %v315_v51 = vrot.slane %v203_v49, 1  ;;  %v205_v56 = vld [vmem:[%s1707_s29 + $0x90] sm:$0xff]  ;;  %v206_v57 = vld [vmem:[%s1707_s29 + $0x98] sm:$0xff]  ;;  %v207_v61 = vld [vmem:[%s1707_s29 + $0xa0] sm:$0x1] }
  0x22   : > { %v311_v44 = vsel %vm288_vm2, %v309_v42, %v310_v43  ;;  %v313_v47 = vsel %vm288_vm2, %v310_v43, %v312_v46  ;;  %v317_v54 = vrot.slane %v204_v53, 1  ;;  %v319_v58 = vrot.slane %v205_v56, 1  ;;  %v208_v0 = vld [vmem:[%s1707_s29 + $0xa8] sm:$0xff]  ;;  %v209_v1 = vld [vmem:[%s1707_s29 + $0xb0] sm:$0xff]  ;;  %v210_v5 = vld [vmem:[%s1707_s29 + $0xb8] sm:$0x1] }
  0x23   : > { %1390 = vmatmul.msk.f32.gmra.mxu2 %vm372_vm1, %v191_v9  ;;  %v316_v52 = vsel %vm288_vm2, %v314_v50, %v315_v51  ;;  %v320_v59 = vrot.slane %v206_v57, 1  ;;  %v322_v62 = vrot.slane %v207_v61, 1  ;;  %v324_v2 = vrot.slane %v208_v0, 1  ;;  %v214_v16 = vld [vmem:[%s1707_s29 + $0xd8] sm:$0xff]  ;;  %v217_v35 = vld [vmem:[%s1707_s29 + $0xf0] sm:$0xff] }
  0x24   : > { %1355 = vmatmul.msk.f32.gmra.mxu1 %vm372_vm1, %v188_v13  ;;  %v318_v55 = vsel %vm288_vm2, %v315_v51, %v317_v54  ;;  %v325_v3 = vrot.slane %v209_v1, 1  ;;  %v327_v6 = vrot.slane %v210_v5, 1  ;;  %v213_v13 = vld [vmem:[%s1707_s29 + $0xd0] sm:$0x1]  ;;  %v334_v18 = vrot.slane %v214_v16, 1 }
  0x25   : > { %v321_v60 = vsel %vm288_vm2, %v319_v58, %v320_v59  ;;  %v323_v63 = vsel %vm288_vm2, %v320_v59, %v322_v62  ;;  %v332_v14 = vrot.slane %v213_v13, 1  ;;  %v219_v50 = vld [vmem:[%s1707_s29 + $0x100] sm:$0x1] }
  0x26   : > { %1425 = vmatmul.msk.f32.gmra.mxu3 %vm372_vm1, %v298_v22  ;;  %v326_v4 = vsel %vm288_vm2, %v324_v2, %v325_v3  ;;  %v328_v7 = vsel %vm288_vm2, %v325_v3, %v327_v6 }
  0x27   : > { %1322 = vmatmul.msk.f32.gmra.mxu0 %vm372_vm1, %v293_v23  ;;  %v216_v23 = vld [vmem:[%s1707_s29 + $0xe8] sm:$0x1] }
  0x28   : > { %v337_v27 = vrot.slane %v216_v23, 1 }
  0x2b   : > { %1391 = vmatmul.msk.f32.gmra.mxu2 %vm372_vm1, %v193_v24 }
  0x2c   : > { %1356 = vmatmul.msk.f32.gmra.mxu1 %vm372_vm1, %v190_v8  ;;  %v211_v8 = vld [vmem:[%s1707_s29 + $0xc0] sm:$0xff] }
  0x2d   : > { %v329_v10 = vrot.slane %v211_v8, 1 }
  0x2e   : > { %1426 = vmatmul.msk.f32.gmra.mxu3 %vm372_vm1, %v301_v28 }
  0x2f   : > { %1323 = vmatmul.msk.f32.gmra.mxu0 %vm372_vm1, %v296_v17  ;;  %v1818_v17 = vld [vmem:[%s1707_s29 + $0xe0] sm:$0xff] }
  0x30   : > { %v335_v19 = vrot.slane %v1818_v17, 1 }
  0x32   : > { %v336_v21 = vsel %vm288_vm2, %v334_v18, %v335_v19 }
  0x33   : > { %1392 = vmatmul.msk.f32.gmra.mxu2 %vm372_vm1, %v194_v25 }
  0x34   : > { %1357 = vmatmul.msk.f32.gmra.mxu1 %vm372_vm1, %v191_v9  ;;  %v212_v9 = vld [vmem:[%s1707_s29 + $0xc8] sm:$0xff] }
  0x35   : > { %v330_v11 = vrot.slane %v212_v9, 1 }
  0x36   : > { %1427 = vmatmul.msk.f32.gmra.mxu3 %vm372_vm1, %v303_v31 }
  0x37   : > { %1324 = vmatmul.msk.f32.gmra.mxu0 %vm372_vm1, %v298_v22  ;;  %v331_v12 = vsel %vm288_vm2, %v329_v10, %v330_v11  ;;  %v333_v15 = vsel %vm288_vm2, %v330_v11, %v332_v14  ;;  %v222_v14 = vld [vmem:[%s1707_s29 + $0x118] sm:$0x1] }
  0x3b   : > { %1393 = vmatmul.msk.f32.gmra.mxu2 %vm372_vm1, %v196_v32 }
  0x3c   : > { %1358 = vmatmul.msk.f32.gmra.mxu1 %vm372_vm1, %v193_v24 }
  0x3e   : > { %1428 = vmatmul.msk.f32.gmra.mxu3 %vm372_vm1, %v306_v36 }
  0x3f   : > { %1325 = vmatmul.msk.f32.gmra.mxu0 %vm372_vm1, %v301_v28  ;;  %v1833_v28 = vld [vmem:[%s2104_s2] ss:$0 sm:$0xff] }
  0x43   : > { %1394 = vmatmul.msk.f32.gmra.mxu2 %vm372_vm1, %v197_v33 }
  0x44   : > { %1359 = vmatmul.msk.f32.gmra.mxu1 %vm372_vm1, %v194_v25 }
  0x46   : > { %1429 = vmatmul.msk.f32.gmra.mxu3 %vm372_vm1, %v308_v39 }
  0x47   : > { %1326 = vmatmul.msk.f32.gmra.mxu0 %vm372_vm1, %v303_v31 }
  0x4b   : > { %1395 = vmatmul.msk.f32.gmra.mxu2 %vm372_vm1, %v199_v40 }
  0x4c   : > { %1360 = vmatmul.msk.f32.gmra.mxu1 %vm372_vm1, %v196_v32  ;;  %v338_v32 = vsel %vm288_vm2, %v335_v19, %v337_v27  ;;  %v347_v19 = vrot.slane %v222_v14, 1  ;;  %v223_v27 = vld [vmem:[%s1707_s29 + $0x120] sm:$0xff] }
  0x4e   : > { %1430 = vmatmul.msk.f32.gmra.mxu3 %vm372_vm1, %v311_v44 }
  0x4f   : > { %1327 = vmatmul.msk.f32.gmra.mxu0 %vm372_vm1, %v306_v36  ;;  %v1844_v36 = vld [vmem:[%s1707_s29 + $0xf8] sm:$0xff] }
  0x50   : > { %v340_v42 = vrot.slane %v1844_v36, 1 }
  0x53   : > { %1396 = vmatmul.msk.f32.gmra.mxu2 %vm372_vm1, %v200_v41 }
  0x54   : > { %1361 = vmatmul.msk.f32.gmra.mxu1 %vm372_vm1, %v197_v33 }
  0x56   : > { %1431 = vmatmul.msk.f32.gmra.mxu3 %vm372_vm1, %v313_v47 }
  0x57   : > { %1328 = vmatmul.msk.f32.gmra.mxu0 %vm372_vm1, %v308_v39 }
  0x5b   : > { %1397 = vmatmul.msk.f32.gmra.mxu2 %vm372_vm1, %v202_v48 }
  0x5c   : > { %1362 = vmatmul.msk.f32.gmra.mxu1 %vm372_vm1, %v199_v40 }
  0x5e   : > { %1432 = vmatmul.msk.f32.gmra.mxu3 %vm372_vm1, %v316_v52 }
  0x5f   : > { %1329 = vmatmul.msk.f32.gmra.mxu0 %vm372_vm1, %v311_v44 }
  0x63   : > { %1398 = vmatmul.msk.f32.gmra.mxu2 %vm372_vm1, %v203_v49 }
  0x64   : > { %1363 = vmatmul.msk.f32.gmra.mxu1 %vm372_vm1, %v200_v41  ;;  %v339_v41 = vrot.slane %v217_v35, 1 }
  0x66   : > { %1433 = vmatmul.msk.f32.gmra.mxu3 %vm372_vm1, %v318_v55 }
  0x67   : > { %1330 = vmatmul.msk.f32.gmra.mxu0 %vm372_vm1, %v313_v47  ;;  %v341_v47 = vsel %vm288_vm2, %v339_v41, %v340_v42 }
  0x6b   : > { %1399 = vmatmul.msk.f32.gmra.mxu2 %vm372_vm1, %v205_v56 }
  0x6c   : > { %1364 = vmatmul.msk.f32.gmra.mxu1 %vm372_vm1, %v202_v48 }
  0x6e   : > { %1434 = vmatmul.msk.f32.gmra.mxu3 %vm372_vm1, %v321_v60 }
  0x6f   : > { %1331 = vmatmul.msk.f32.gmra.mxu0 %vm372_vm1, %v316_v52 }
  0x73   : > { %1400 = vmatmul.msk.f32.gmra.mxu2 %vm372_vm1, %v206_v57 }
  0x74   : > { %1365 = vmatmul.msk.f32.gmra.mxu1 %vm372_vm1, %v203_v49 }
  0x76   : > { %1435 = vmatmul.msk.f32.gmra.mxu3 %vm372_vm1, %v323_v63 }
  0x77   : > { %1332 = vmatmul.msk.f32.gmra.mxu0 %vm372_vm1, %v318_v55  ;;  %v342_v55 = vrot.slane %v219_v50, 1 }
  0x7b   : > { %1401 = vmatmul.msk.f32.gmra.mxu2 %vm372_vm1, %v208_v0 }
  0x7c   : > { %1366 = vmatmul.msk.f32.gmra.mxu1 %vm372_vm1, %v205_v56 }
  0x7e   : > { %1436 = vmatmul.msk.f32.gmra.mxu3 %vm372_vm1, %v326_v4 }
  0x7f   : > { %1333 = vmatmul.msk.f32.gmra.mxu0 %vm372_vm1, %v321_v60  ;;  %v343_v60 = vsel %vm288_vm2, %v340_v42, %v342_v55 }
  0x83   : > { %1402 = vmatmul.msk.f32.gmra.mxu2 %vm372_vm1, %v209_v1 }
  0x84   : > { %1367 = vmatmul.msk.f32.gmra.mxu1 %vm372_vm1, %v206_v57 }
  0x86   : > { %1437 = vmatmul.msk.f32.gmra.mxu3 %vm372_vm1, %v328_v7 }
  0x87   : > { %1334 = vmatmul.msk.f32.gmra.mxu0 %vm372_vm1, %v323_v63  ;;  %v220_v63 = vld [vmem:[%s1707_s29 + $0x108] sm:$0xff] }
  0x88   : > { %v344_v5 = vrot.slane %v220_v63, 1 }
  0x8b   : > { %1403 = vmatmul.msk.f32.gmra.mxu2 %vm372_vm1, %v211_v8 }
  0x8c   : > { %1368 = vmatmul.msk.f32.gmra.mxu1 %vm372_vm1, %v208_v0  ;;  %v1870_v0 = vld [vmem:[%s1707_s29 + $0x110] sm:$0xff] }
  0x8d   : > { %v345_v6 = vrot.slane %v1870_v0, 1 }
  0x8e   : > { %1438 = vmatmul.msk.f32.gmra.mxu3 %vm372_vm1, %v331_v12 }
  0x8f   : > { %1335 = vmatmul.msk.f32.gmra.mxu0 %vm372_vm1, %v326_v4  ;;  %v346_v11 = vsel %vm288_vm2, %v344_v5, %v345_v6 }
  0x93   : > { %1404 = vmatmul.msk.f32.gmra.mxu2 %vm372_vm1, %v212_v9 }
  0x94   : > { %1369 = vmatmul.msk.f32.gmra.mxu1 %vm372_vm1, %v209_v1 }
  0x96   : > { %1439 = vmatmul.msk.f32.gmra.mxu3 %vm372_vm1, %v333_v15 }
  0x97   : > { %1336 = vmatmul.msk.f32.gmra.mxu0 %vm372_vm1, %v328_v7 }
  0x99   : > { %v638_v20 = vpop.f32.mrf.mxu1 }
  0x9b   : > { %1405 = vmatmul.msk.f32.gmra.mxu2 %vm372_vm1, %v214_v16 }
  0x9c   : > { %1370 = vmatmul.msk.f32.gmra.mxu1 %vm372_vm1, %v211_v8  ;;  %v458_v22 = vpop.f32.mrf.mxu0 }
  0x9d   : > { %v639_v24 = vadd.f32 %v638_v20, %v458_v22 }
  0x9e   : > { %1440 = vmatmul.msk.f32.gmra.mxu3 %vm372_vm1, %v336_v21  ;;  %v763_v25 = vpop.f32.mrf.mxu2 }
  0x9f   : > { %v859_v26 = vadd.f32 %v763_v25, %v639_v24  ;;  %1337 = vmatmul.msk.f32.gmra.mxu0 %vm372_vm1, %v331_v12  ;;  %v348_v24 = vsel %vm288_vm2, %v345_v6, %v347_v19 }
  0xa1   : > { %v641_v29 = vpop.f32.mrf.mxu1  ;;  %v924_v30 = vpop.f32.mrf.mxu3 }
  0xa2   : > { %v1020_v31 = vadd.f32 %v924_v30, %v859_v26 }
  0xa3   : > { %1406 = vmatmul.msk.f32.gmra.mxu2 %vm372_vm1, %v1818_v17 }
  0xa4   : > { %1371 = vmatmul.msk.f32.gmra.mxu1 %vm372_vm1, %v212_v9  ;;  %v1056_v33 = vadd.f32 %v1833_v28, %v1020_v31  ;;  %v461_v34 = vpop.f32.mrf.mxu0 }
  0xa5   : > { %v642_v37 = vadd.f32 %v641_v29, %v461_v34  ;;  %v1894_v29 = vld [vmem:[%s1707_s29 + $0x128] sm:$0xff]  ;;  %v349_v34 = vrot.slane %v223_v27, 1 }
  0xa6   : > { %vm1088_vm3 = vcmp.ge.f32.partialorder %v1056_v33, 0.0  ;;  %v1120_v38 = vmul.f32 0.2, %v1056_v33  ;;  %1441 = vmatmul.msk.f32.gmra.mxu3 %vm372_vm1, %v338_v32  ;;  %v766_v39 = vpop.f32.mrf.mxu2 }
  0xa7   : > { %v860_v40 = vadd.f32 %v766_v39, %v642_v37  ;;  %1338 = vmatmul.msk.f32.gmra.mxu0 %vm372_vm1, %v333_v15 }
  0xa8   : > { %v1152_v43 = vsel %vm1088_vm3, %v1056_v33, %v1120_v38 }
  0xa9   : > { %v644_v44 = vpop.f32.mrf.mxu1  ;;  %1185 = vst.msk [vmem:[%s1849_s7] sm:$0xff] %vm1184_vm4, %v1152_v43  ;;  %v927_v45 = vpop.f32.mrf.mxu3  ;;  %v225_v43 = vld [vmem:[%s1707_s29 + $0x130] sm:$0x1] }
  0xaa   : > { %v1021_v46 = vadd.f32 %v927_v45, %v860_v40 }
  0xab   : > { %1407 = vmatmul.msk.f32.gmra.mxu2 %vm372_vm1, %v217_v35 }
  0xac   : > { %1372 = vmatmul.msk.f32.gmra.mxu1 %vm372_vm1, %v214_v16  ;;  %v1057_v48 = vadd.f32 %v1833_v28, %v1021_v46  ;;  %v464_v49 = vpop.f32.mrf.mxu0 }
  0xad   : > { %v645_v51 = vadd.f32 %v644_v44, %v464_v49 }
  0xae   : > { %vm1089_vm5 = vcmp.ge.f32.partialorder %v1057_v48, 0.0  ;;  %v1121_v52 = vmul.f32 0.2, %v1057_v48  ;;  %1442 = vmatmul.msk.f32.gmra.mxu3 %vm372_vm1, %v341_v47  ;;  %v769_v53 = vpop.f32.mrf.mxu2 }
  0xaf   : > { %v861_v54 = vadd.f32 %v769_v53, %v645_v51  ;;  %1339 = vmatmul.msk.f32.gmra.mxu0 %vm372_vm1, %v336_v21 }
  0xb0   : > { %v1153_v56 = vsel %vm1089_vm5, %v1057_v48, %v1121_v52  ;;  %v352_v48 = vrot.slane %v225_v43, 1 }
  0xb1   : > { %v647_v57 = vpop.f32.mrf.mxu1  ;;  %1186 = vst.msk [vmem:[%s1849_s7 + $0x8] sm:$0xff] %vm1184_vm4, %v1153_v56  ;;  %v930_v58 = vpop.f32.mrf.mxu3  ;;  %v226_v56 = vld [vmem:[%s1707_s29 + $0x138] sm:$0xff] }
  0xb2   : > { %v1022_v59 = vadd.f32 %v930_v58, %v861_v54 }
  0xb3   : > { %1408 = vmatmul.msk.f32.gmra.mxu2 %vm372_vm1, %v1844_v36 }
  0xb4   : > { %1373 = vmatmul.msk.f32.gmra.mxu1 %vm372_vm1, %v1818_v17  ;;  %v1058_v61 = vadd.f32 %v1833_v28, %v1022_v59  ;;  %v467_v62 = vpop.f32.mrf.mxu0 }
  0xb5   : > { %v648_v1 = vadd.f32 %v647_v57, %v467_v62  ;;  %v1918_v57 = vld [vmem:[%s1707_s29 + $0x140] sm:$0xff]  ;;  %v354_v62 = vrot.slane %v226_v56, 1 }
  0xb6   : > { %vm1090_vm6 = vcmp.ge.f32.partialorder %v1058_v61, 0.0  ;;  %v1122_v2 = vmul.f32 0.2, %v1058_v61  ;;  %1443 = vmatmul.msk.f32.gmra.mxu3 %vm372_vm1, %v343_v60  ;;  %v772_v3 = vpop.f32.mrf.mxu2 }
  0xb7   : > { %v862_v4 = vadd.f32 %v772_v3, %v648_v1  ;;  %1340 = vmatmul.msk.f32.gmra.mxu0 %vm372_vm1, %v338_v32 }
  0xb8   : > { %v1154_v7 = vsel %vm1090_vm6, %v1058_v61, %v1122_v2 }
  0xb9   : > { %v650_v8 = vpop.f32.mrf.mxu1  ;;  %1187 = vst.msk [vmem:[%s1849_s7 + $0x10] sm:$0xff] %vm1184_vm4, %v1154_v7  ;;  %v933_v9 = vpop.f32.mrf.mxu3  ;;  %v228_v7 = vld [vmem:[%s1707_s29 + $0x148] sm:$0x1] }
  0xba   : > { %v1023_v10 = vadd.f32 %v933_v9, %v862_v4 }
  0xbb   : > { %1409 = vmatmul.msk.f32.gmra.mxu2 %vm372_vm1, %v220_v63 }
  0xbc   : > { %1374 = vmatmul.msk.f32.gmra.mxu1 %vm372_vm1, %v217_v35  ;;  %v1059_v12 = vadd.f32 %v1833_v28, %v1023_v10  ;;  %v470_v13 = vpop.f32.mrf.mxu0  ;;  %v350_v35 = vrot.slane %v1894_v29, 1 }
  0xbd   : > { %v651_v15 = vadd.f32 %v650_v8, %v470_v13 }
  0xbe   : > { %vm1091_vm7 = vcmp.ge.f32.partialorder %v1059_v12, 0.0  ;;  %v1123_v16 = vmul.f32 0.2, %v1059_v12  ;;  %1444 = vmatmul.msk.f32.gmra.mxu3 %vm372_vm1, %v346_v11  ;;  %v775_v17 = vpop.f32.mrf.mxu2  ;;  %v351_v40 = vsel %vm288_vm2, %v349_v34, %v350_v35  ;;  %v353_v53 = vsel %vm288_vm2, %v350_v35, %v352_v48 }
  0xbf   : > { %v863_v18 = vadd.f32 %v775_v17, %v651_v15  ;;  %1341 = vmatmul.msk.f32.gmra.mxu0 %vm372_vm1, %v341_v47 }
  0xc0   : > { %v1155_v20 = vsel %vm1091_vm7, %v1059_v12, %v1123_v16  ;;  %v357_v12 = vrot.slane %v228_v7, 1 }
  0xc1   : > { %v653_v21 = vpop.f32.mrf.mxu1  ;;  %1188 = vst.msk [vmem:[%s1849_s7 + $0x18] sm:$0xff] %vm1184_vm4, %v1155_v20  ;;  %v936_v22 = vpop.f32.mrf.mxu3  ;;  %v229_v20 = vld [vmem:[%s1707_s29 + $0x150] sm:$0xff] }
  0xc2   : > { %v1024_v23 = vadd.f32 %v936_v22, %v863_v18 }
  0xc3   : > { %1410 = vmatmul.msk.f32.gmra.mxu2 %vm372_vm1, %v1870_v0 }
  0xc4   : > { %1375 = vmatmul.msk.f32.gmra.mxu1 %vm372_vm1, %v1844_v36  ;;  %v1060_v25 = vadd.f32 %v1833_v28, %v1024_v23  ;;  %v473_v26 = vpop.f32.mrf.mxu0 }
  0xc5   : > { %v654_v30 = vadd.f32 %v653_v21, %v473_v26  ;;  %v1942_v21 = vld [vmem:[%s1707_s29 + $0x158] sm:$0xff]  ;;  %v359_v26 = vrot.slane %v229_v20, 1 }
  0xc6   : > { %vm1092_vm8 = vcmp.ge.f32.partialorder %v1060_v25, 0.0  ;;  %v1124_v31 = vmul.f32 0.2, %v1060_v25  ;;  %1445 = vmatmul.msk.f32.gmra.mxu3 %vm372_vm1, %v348_v24  ;;  %v778_v32 = vpop.f32.mrf.mxu2 }
  0xc7   : > { %v864_v33 = vadd.f32 %v778_v32, %v654_v30  ;;  %1342 = vmatmul.msk.f32.gmra.mxu0 %vm372_vm1, %v343_v60 }
  0xc8   : > { %v1156_v36 = vsel %vm1092_vm8, %v1060_v25, %v1124_v31 }
  0xc9   : > { %v656_v37 = vpop.f32.mrf.mxu1  ;;  %1189 = vst.msk [vmem:[%s1849_s7 + $0x20] sm:$0xff] %vm1184_vm4, %v1156_v36  ;;  %v939_v38 = vpop.f32.mrf.mxu3  ;;  %v231_v36 = vld [vmem:[%s1707_s29 + $0x160] sm:$0x1] }
  0xca   : > { %v1025_v39 = vadd.f32 %v939_v38, %v864_v33 }
  0xcb   : > { %1411 = vmatmul.msk.f32.gmra.mxu2 %vm372_vm1, %v223_v27 }
  0xcc   : > { %1376 = vmatmul.msk.f32.gmra.mxu1 %vm372_vm1, %v220_v63  ;;  %v1061_v41 = vadd.f32 %v1833_v28, %v1025_v39  ;;  %v476_v42 = vpop.f32.mrf.mxu0  ;;  %v355_v63 = vrot.slane %v1918_v57, 1 }
  0xcd   : > { %v657_v44 = vadd.f32 %v656_v37, %v476_v42 }
  0xce   : > { %vm1093_vm9 = vcmp.ge.f32.partialorder %v1061_v41, 0.0  ;;  %v1125_v45 = vmul.f32 0.2, %v1061_v41  ;;  %1446 = vmatmul.msk.f32.gmra.mxu3 %vm372_vm1, %v351_v40  ;;  %v781_v46 = vpop.f32.mrf.mxu2  ;;  %v356_v4 = vsel %vm288_vm2, %v354_v62, %v355_v63  ;;  %v358_v17 = vsel %vm288_vm2, %v355_v63, %v357_v12 }
  0xcf   : > { %v865_v47 = vadd.f32 %v781_v46, %v657_v44  ;;  %1343 = vmatmul.msk.f32.gmra.mxu0 %vm372_vm1, %v346_v11 }
  0xd0   : > { %v1157_v49 = vsel %vm1093_vm9, %v1061_v41, %v1125_v45  ;;  %v362_v41 = vrot.slane %v231_v36, 1 }
  0xd1   : > { %v659_v50 = vpop.f32.mrf.mxu1  ;;  %1190 = vst.msk [vmem:[%s1849_s7 + $0x28] sm:$0xff] %vm1184_vm4, %v1157_v49  ;;  %v942_v51 = vpop.f32.mrf.mxu3  ;;  %v232_v49 = vld [vmem:[%s1707_s29 + $0x168] sm:$0xff] }
  0xd2   : > { %v1026_v52 = vadd.f32 %v942_v51, %v865_v47 }
  0xd3   : > { %1412 = vmatmul.msk.f32.gmra.mxu2 %vm372_vm1, %v1894_v29 }
  0xd4   : > { %1377 = vmatmul.msk.f32.gmra.mxu1 %vm372_vm1, %v1870_v0  ;;  %v1062_v54 = vadd.f32 %v1833_v28, %v1026_v52  ;;  %v479_v55 = vpop.f32.mrf.mxu0 }
  0xd5   : > { %v660_v58 = vadd.f32 %v659_v50, %v479_v55  ;;  %v1966_v50 = vld [vmem:[%s1707_s29 + $0x170] sm:$0xff]  ;;  %v364_v55 = vrot.slane %v232_v49, 1 }
  0xd6   : > { %vm1094_vm10 = vcmp.ge.f32.partialorder %v1062_v54, 0.0  ;;  %v1126_v59 = vmul.f32 0.2, %v1062_v54  ;;  %1447 = vmatmul.msk.f32.gmra.mxu3 %vm372_vm1, %v353_v53  ;;  %v784_v60 = vpop.f32.mrf.mxu2 }
  0xd7   : > { %v866_v61 = vadd.f32 %v784_v60, %v660_v58  ;;  %1344 = vmatmul.msk.f32.gmra.mxu0 %vm372_vm1, %v348_v24 }
  0xd8   : > { %v1158_v0 = vsel %vm1094_vm10, %v1062_v54, %v1126_v59 }
  0xd9   : > { %v662_v1 = vpop.f32.mrf.mxu1  ;;  %1191 = vst.msk [vmem:[%s1849_s7 + $0x30] sm:$0xff] %vm1184_vm4, %v1158_v0  ;;  %v945_v2 = vpop.f32.mrf.mxu3  ;;  %v234_v0 = vld [vmem:[%s1707_s29 + $0x178] sm:$0x1] }
  0xda   : > { %v1027_v3 = vadd.f32 %v945_v2, %v866_v61 }
  0xdb   : > { %1413 = vmatmul.msk.f32.gmra.mxu2 %vm372_vm1, %v226_v56 }
  0xdc   : > { %1378 = vmatmul.msk.f32.gmra.mxu1 %vm372_vm1, %v223_v27  ;;  %v1063_v5 = vadd.f32 %v1833_v28, %v1027_v3  ;;  %v482_v6 = vpop.f32.mrf.mxu0  ;;  %v360_v27 = vrot.slane %v1942_v21, 1 }
  0xdd   : > { %v663_v8 = vadd.f32 %v662_v1, %v482_v6 }
  0xde   : > { %vm1095_vm11 = vcmp.ge.f32.partialorder %v1063_v5, 0.0  ;;  %v1127_v9 = vmul.f32 0.2, %v1063_v5  ;;  %1448 = vmatmul.msk.f32.gmra.mxu3 %vm372_vm1, %v356_v4  ;;  %v787_v10 = vpop.f32.mrf.mxu2  ;;  %v361_v33 = vsel %vm288_vm2, %v359_v26, %v360_v27  ;;  %v363_v46 = vsel %vm288_vm2, %v360_v27, %v362_v41 }
  0xdf   : > { %v867_v11 = vadd.f32 %v787_v10, %v663_v8  ;;  %1345 = vmatmul.msk.f32.gmra.mxu0 %vm372_vm1, %v351_v40 }
  0xe0   : > { %v1159_v13 = vsel %vm1095_vm11, %v1063_v5, %v1127_v9  ;;  %v367_v5 = vrot.slane %v234_v0, 1 }
  0xe1   : > { %v665_v14 = vpop.f32.mrf.mxu1  ;;  %1192 = vst.msk [vmem:[%s1849_s7 + $0x38] sm:$0xff] %vm1184_vm4, %v1159_v13  ;;  %v948_v15 = vpop.f32.mrf.mxu3  ;;  %v235_v13 = vld [vmem:[%s1707_s29 + $0x180] sm:$0xff] }
  0xe2   : > { %v1028_v16 = vadd.f32 %v948_v15, %v867_v11 }
  0xe3   : > { %1414 = vmatmul.msk.f32.gmra.mxu2 %vm372_vm1, %v1918_v57 }
  0xe4   : > { %1379 = vmatmul.msk.f32.gmra.mxu1 %vm372_vm1, %v1894_v29  ;;  %v1064_v18 = vadd.f32 %v1833_v28, %v1028_v16  ;;  %v485_v19 = vpop.f32.mrf.mxu0 }
  0xe5   : > { %v666_v22 = vadd.f32 %v665_v14, %v485_v19  ;;  %v236_v14 = vld [vmem:[%s1707_s29 + $0x188] sm:$0xff]  ;;  %v892_v19 = vrot.slane %v235_v13, 1 }
  0xe6   : > { %vm1096_vm12 = vcmp.ge.f32.partialorder %v1064_v18, 0.0  ;;  %v1128_v23 = vmul.f32 0.2, %v1064_v18  ;;  %1449 = vmatmul.msk.f32.gmra.mxu3 %vm372_vm1, %v358_v17  ;;  %v790_v24 = vpop.f32.mrf.mxu2 }
  0xe7   : > { %v868_v25 = vadd.f32 %v790_v24, %v666_v22  ;;  %1346 = vmatmul.msk.f32.gmra.mxu0 %vm372_vm1, %v353_v53 }
  0xe8   : > { %v1160_v29 = vsel %vm1096_vm12, %v1064_v18, %v1128_v23 }
  0xe9   : > { %v668_v30 = vpop.f32.mrf.mxu1  ;;  %1193 = vst.msk [vmem:[%s1849_s7 + $0x40] sm:$0xff] %vm1184_vm4, %v1160_v29  ;;  %v951_v31 = vpop.f32.mrf.mxu3  ;;  %v237_v29 = vld [vmem:[%s1707_s29 + $0x190] sm:$0x1] }
  0xea   : > { %v1029_v32 = vadd.f32 %v951_v31, %v868_v25 }
  0xeb   : > { %1415 = vmatmul.msk.f32.gmra.mxu2 %vm372_vm1, %v229_v20 }
  0xec   : > { %1380 = vmatmul.msk.f32.gmra.mxu1 %vm372_vm1, %v226_v56  ;;  %v1065_v34 = vadd.f32 %v1833_v28, %v1029_v32  ;;  %v488_v35 = vpop.f32.mrf.mxu0  ;;  %v365_v56 = vrot.slane %v1966_v50, 1 }
  0xed   : > { %v669_v37 = vadd.f32 %v668_v30, %v488_v35 }
  0xee   : > { %vm1097_vm13 = vcmp.ge.f32.partialorder %v1065_v34, 0.0  ;;  %v1129_v38 = vmul.f32 0.2, %v1065_v34  ;;  %1450 = vmatmul.msk.f32.gmra.mxu3 %vm372_vm1, %v361_v33  ;;  %v793_v39 = vpop.f32.mrf.mxu2  ;;  %v366_v61 = vsel %vm288_vm2, %v364_v55, %v365_v56  ;;  %v368_v10 = vsel %vm288_vm2, %v365_v56, %v367_v5 }
  0xef   : > { %v869_v40 = vadd.f32 %v793_v39, %v669_v37  ;;  %1347 = vmatmul.msk.f32.gmra.mxu0 %vm372_vm1, %v356_v4 }
  0xf0   : > { %v1161_v42 = vsel %vm1097_vm13, %v1065_v34, %v1129_v38  ;;  %v895_v34 = vrot.slane %v237_v29, 1 }
  0xf1   : > { %v671_v43 = vpop.f32.mrf.mxu1  ;;  %1194 = vst.msk [vmem:[%s1849_s7 + $0x48] sm:$0xff] %vm1184_vm4, %v1161_v42  ;;  %v954_v44 = vpop.f32.mrf.mxu3 }
  0xf2   : > { %v1030_v45 = vadd.f32 %v954_v44, %v869_v40 }
  0xf3   : > { %1416 = vmatmul.msk.f32.gmra.mxu2 %vm372_vm1, %v1942_v21 }
  0xf4   : > { %1381 = vmatmul.msk.f32.gmra.mxu1 %vm372_vm1, %v1918_v57  ;;  %v1066_v47 = vadd.f32 %v1833_v28, %v1030_v45  ;;  %v491_v48 = vpop.f32.mrf.mxu0 }
  0xf5   : > { %v672_v51 = vadd.f32 %v671_v43, %v491_v48 }
  0xf6   : > { %vm1098_vm14 = vcmp.ge.f32.partialorder %v1066_v47, 0.0  ;;  %v1130_v52 = vmul.f32 0.2, %v1066_v47  ;;  %1451 = vmatmul.msk.f32.gmra.mxu3 %vm372_vm1, %v363_v46  ;;  %v796_v53 = vpop.f32.mrf.mxu2 }
  0xf7   : > { %v870_v54 = vadd.f32 %v796_v53, %v672_v51  ;;  %1348 = vmatmul.msk.f32.gmra.mxu0 %vm372_vm1, %v358_v17 }
  0xf8   : > { %v1162_v57 = vsel %vm1098_vm14, %v1066_v47, %v1130_v52 }
  0xf9   : > { %v674_v58 = vpop.f32.mrf.mxu1  ;;  %1195 = vst.msk [vmem:[%s1849_s7 + $0x50] sm:$0xff] %vm1184_vm4, %v1162_v57  ;;  %v957_v59 = vpop.f32.mrf.mxu3 }
  0xfa   : > { %v1031_v60 = vadd.f32 %v957_v59, %v870_v54 }
  0xfb   : > { %1417 = vmatmul.msk.f32.gmra.mxu2 %vm372_vm1, %v232_v49 }
  0xfc   : > { %1382 = vmatmul.msk.f32.gmra.mxu1 %vm372_vm1, %v229_v20  ;;  %v1067_v62 = vadd.f32 %v1833_v28, %v1031_v60  ;;  %v494_v63 = vpop.f32.mrf.mxu0  ;;  %v893_v20 = vrot.slane %v236_v14, 1 }
  0xfd   : > { %v675_v1 = vadd.f32 %v674_v58, %v494_v63 }
  0xfe   : > { %vm1099_vm15 = vcmp.ge.f32.partialorder %v1067_v62, 0.0  ;;  %v1131_v2 = vmul.f32 0.2, %v1067_v62  ;;  %1452 = vmatmul.msk.f32.gmra.mxu3 %vm372_vm1, %v366_v61  ;;  %v799_v3 = vpop.f32.mrf.mxu2  ;;  %v894_v25 = vsel %vm288_vm2, %v892_v19, %v893_v20  ;;  %v896_v39 = vsel %vm288_vm2, %v893_v20, %v895_v34 }
  0xff   : > { %v871_v4 = vadd.f32 %v799_v3, %v675_v1  ;;  %1349 = vmatmul.msk.f32.gmra.mxu0 %vm372_vm1, %v361_v33 }
 0x100   : > { %v1163_v6 = vsel %vm1099_vm15, %v1067_v62, %v1131_v2 }
 0x101   : > { %v677_v7 = vpop.f32.mrf.mxu1  ;;  %1196 = vst.msk [vmem:[%s1849_s7 + $0x58] sm:$0xff] %vm1184_vm4, %v1163_v6  ;;  %v960_v8 = vpop.f32.mrf.mxu3 }
 0x102   : > { %v1032_v9 = vadd.f32 %v960_v8, %v871_v4 }
 0x103   : > { %1418 = vmatmul.msk.f32.gmra.mxu2 %vm372_vm1, %v1966_v50 }
 0x104   : > { %1383 = vmatmul.msk.f32.gmra.mxu1 %vm372_vm1, %v1942_v21  ;;  %v1068_v11 = vadd.f32 %v1833_v28, %v1032_v9  ;;  %v497_v12 = vpop.f32.mrf.mxu0 }
 0x105   : > { %v678_v15 = vadd.f32 %v677_v7, %v497_v12 }
 0x106   : > { %vm1100_vm0 = vcmp.ge.f32.partialorder %v1068_v11, 0.0  ;;  %v1132_v16 = vmul.f32 0.2, %v1068_v11  ;;  %1453 = vmatmul.msk.f32.gmra.mxu3 %vm372_vm1, %v368_v10  ;;  %v802_v17 = vpop.f32.mrf.mxu2 }
 0x107   : > { %v872_v18 = vadd.f32 %v802_v17, %v678_v15  ;;  %1350 = vmatmul.msk.f32.gmra.mxu0 %vm372_vm1, %v363_v46 }
 0x108   : > { %v1164_v22 = vsel %vm1100_vm0, %v1068_v11, %v1132_v16 }
 0x109   : > { %v680_v21 = vpop.f32.mrf.mxu1  ;;  %1197 = vst.msk [vmem:[%s1849_s7 + $0x60] sm:$0xff] %vm1184_vm4, %v1164_v22  ;;  %v963_v23 = vpop.f32.mrf.mxu3 }
 0x10a   : > { %v1033_v24 = vadd.f32 %v963_v23, %v872_v18 }
 0x10b   : > { %1419 = vmatmul.msk.f32.gmra.mxu2 %vm372_vm1, %v235_v13 }
 0x10c   : > { %1384 = vmatmul.msk.f32.gmra.mxu1 %vm372_vm1, %v232_v49  ;;  %v1069_v26 = vadd.f32 %v1833_v28, %v1033_v24  ;;  %v500_v27 = vpop.f32.mrf.mxu0 }
 0x10d   : > { %v681_v30 = vadd.f32 %v680_v21, %v500_v27 }
 0x10e   : > { %vm1101_vm3 = vcmp.ge.f32.partialorder %v1069_v26, 0.0  ;;  %v1133_v31 = vmul.f32 0.2, %v1069_v26  ;;  %1454 = vmatmul.msk.f32.gmra.mxu3 %vm372_vm1, %v894_v25  ;;  %v805_v32 = vpop.f32.mrf.mxu2 }
 0x10f   : > { %v873_v33 = vadd.f32 %v805_v32, %v681_v30  ;;  %1351 = vmatmul.msk.f32.gmra.mxu0 %vm372_vm1, %v366_v61 }
 0x110   : > { %v1165_v35 = vsel %vm1101_vm3, %v1069_v26, %v1133_v31 }
 0x111   : > { %v683_v36 = vpop.f32.mrf.mxu1  ;;  %1198 = vst.msk [vmem:[%s1849_s7 + $0x68] sm:$0xff] %vm1184_vm4, %v1165_v35  ;;  %v966_v37 = vpop.f32.mrf.mxu3 }
 0x112   : > { %v1034_v38 = vadd.f32 %v966_v37, %v873_v33 }
 0x113   : > { %1420 = vmatmul.msk.f32.gmra.mxu2 %vm372_vm1, %v236_v14 }
 0x114   : > { %1385 = vmatmul.msk.f32.gmra.mxu1 %vm372_vm1, %v1966_v50  ;;  %v1070_v40 = vadd.f32 %v1833_v28, %v1034_v38  ;;  %v503_v41 = vpop.f32.mrf.mxu0 }
 0x115   : > { %v684_v42 = vadd.f32 %v683_v36, %v503_v41 }
 0x116   : > { %vm1102_vm5 = vcmp.ge.f32.partialorder %v1070_v40, 0.0  ;;  %v1134_v43 = vmul.f32 0.2, %v1070_v40  ;;  %1455 = vmatmul.msk.f32.gmra.mxu3 %vm372_vm1, %v896_v39  ;;  %v808_v44 = vpop.f32.mrf.mxu2 }
 0x117   : > { %v874_v45 = vadd.f32 %v808_v44, %v684_v42  ;;  %1352 = vmatmul.msk.f32.gmra.mxu0 %vm372_vm1, %v368_v10 }
 0x118   : > { %v1166_v46 = vsel %vm1102_vm5, %v1070_v40, %v1134_v43 }
 0x119   : > { %v686_v47 = vpop.f32.mrf.mxu1  ;;  %1199 = vst.msk [vmem:[%s1849_s7 + $0x70] sm:$0xff] %vm1184_vm4, %v1166_v46  ;;  %v969_v48 = vpop.f32.mrf.mxu3 }
 0x11a   : > { %v1035_v49 = vadd.f32 %v969_v48, %v874_v45 }
 0x11c   : > { %v1071_v50 = vadd.f32 %v1833_v28, %v1035_v49  ;;  %v506_v51 = vpop.f32.mrf.mxu0 }
 0x11d   : > { %v687_v52 = vadd.f32 %v686_v47, %v506_v51 }
 0x11e   : > { %vm1103_vm2 = vcmp.ge.f32.partialorder %v1071_v50, 0.0  ;;  %v1135_v53 = vmul.f32 0.2, %v1071_v50  ;;  %v811_v54 = vpop.f32.mrf.mxu2 }
 0x11f   : > { %v875_v55 = vadd.f32 %v811_v54, %v687_v52 }
 0x120   : > { %v1167_v56 = vsel %vm1103_vm2, %v1071_v50, %v1135_v53 }
 0x121   : > { %v689_v57 = vpop.f32.mrf.mxu1  ;;  %1200 = vst.msk [vmem:[%s1849_s7 + $0x78] sm:$0xff] %vm1184_vm4, %v1167_v56  ;;  %v972_v58 = vpop.f32.mrf.mxu3 }
 0x122   : > { %v1036_v59 = vadd.f32 %v972_v58, %v875_v55 }
 0x124   : > { %v1072_v60 = vadd.f32 %v1833_v28, %v1036_v59  ;;  %v509_v61 = vpop.f32.mrf.mxu0 }
 0x125   : > { %v690_v62 = vadd.f32 %v689_v57, %v509_v61 }
 0x126   : > { %vm1104_vm1 = vcmp.ge.f32.partialorder %v1072_v60, 0.0  ;;  %v1136_v63 = vmul.f32 0.2, %v1072_v60  ;;  %v814_v0 = vpop.f32.mrf.mxu2 }
 0x127   : > { %v876_v1 = vadd.f32 %v814_v0, %v690_v62 }
 0x128   : > { %v1168_v2 = vsel %vm1104_vm1, %v1072_v60, %v1136_v63 }
 0x129   : > { %v692_v3 = vpop.f32.mrf.mxu1  ;;  %1201 = vst.msk [vmem:[%s1849_s7 + $0x80] sm:$0xff] %vm1184_vm4, %v1168_v2  ;;  %v975_v4 = vpop.f32.mrf.mxu3 }
 0x12a   : > { %v1037_v5 = vadd.f32 %v975_v4, %v876_v1 }
 0x12c   : > { %v1073_v6 = vadd.f32 %v1833_v28, %v1037_v5  ;;  %v512_v7 = vpop.f32.mrf.mxu0 }
 0x12d   : > { %v693_v8 = vadd.f32 %v692_v3, %v512_v7 }
 0x12e   : > { %vm1105_vm6 = vcmp.ge.f32.partialorder %v1073_v6, 0.0  ;;  %v1137_v9 = vmul.f32 0.2, %v1073_v6  ;;  %v817_v10 = vpop.f32.mrf.mxu2 }
 0x12f   : > { %v877_v11 = vadd.f32 %v817_v10, %v693_v8 }
 0x130   : > { %v1169_v12 = vsel %vm1105_vm6, %v1073_v6, %v1137_v9 }
 0x131   : > { %v695_v13 = vpop.f32.mrf.mxu1  ;;  %1202 = vst.msk [vmem:[%s1849_s7 + $0x88] sm:$0xff] %vm1184_vm4, %v1169_v12  ;;  %v978_v14 = vpop.f32.mrf.mxu3 }
 0x132   : > { %v1038_v15 = vadd.f32 %v978_v14, %v877_v11 }
 0x134   : > { %v1074_v16 = vadd.f32 %v1833_v28, %v1038_v15  ;;  %v515_v17 = vpop.f32.mrf.mxu0 }
 0x135   : > { %v696_v18 = vadd.f32 %v695_v13, %v515_v17 }
 0x136   : > { %vm1106_vm7 = vcmp.ge.f32.partialorder %v1074_v16, 0.0  ;;  %v1138_v19 = vmul.f32 0.2, %v1074_v16  ;;  %v820_v20 = vpop.f32.mrf.mxu2 }
 0x137   : > { %v878_v22 = vadd.f32 %v820_v20, %v696_v18 }
 0x138   : > { %v1170_v21 = vsel %vm1106_vm7, %v1074_v16, %v1138_v19 }
 0x139   : > { %v698_v23 = vpop.f32.mrf.mxu1  ;;  %1203 = vst.msk [vmem:[%s1849_s7 + $0x90] sm:$0xff] %vm1184_vm4, %v1170_v21  ;;  %v981_v24 = vpop.f32.mrf.mxu3 }
 0x13a   : > { %v1039_v25 = vadd.f32 %v981_v24, %v878_v22 }
 0x13c   : > { %v1075_v26 = vadd.f32 %v1833_v28, %v1039_v25  ;;  %v518_v27 = vpop.f32.mrf.mxu0 }
 0x13d   : > { %v699_v29 = vadd.f32 %v698_v23, %v518_v27 }
 0x13e   : > { %vm1107_vm8 = vcmp.ge.f32.partialorder %v1075_v26, 0.0  ;;  %v1139_v30 = vmul.f32 0.2, %v1075_v26  ;;  %v823_v31 = vpop.f32.mrf.mxu2 }
 0x13f   : > { %v879_v32 = vadd.f32 %v823_v31, %v699_v29 }
 0x140   : > { %v1171_v33 = vsel %vm1107_vm8, %v1075_v26, %v1139_v30 }
 0x141   : > { %v701_v34 = vpop.f32.mrf.mxu1  ;;  %1204 = vst.msk [vmem:[%s1849_s7 + $0x98] sm:$0xff] %vm1184_vm4, %v1171_v33  ;;  %v984_v35 = vpop.f32.mrf.mxu3 }
 0x142   : > { %v1040_v36 = vadd.f32 %v984_v35, %v879_v32 }
 0x144   : > { %v1076_v37 = vadd.f32 %v1833_v28, %v1040_v36  ;;  %v521_v38 = vpop.f32.mrf.mxu0 }
 0x145   : > { %v702_v39 = vadd.f32 %v701_v34, %v521_v38 }
 0x146   : > { %vm1108_vm9 = vcmp.ge.f32.partialorder %v1076_v37, 0.0  ;;  %v1140_v40 = vmul.f32 0.2, %v1076_v37  ;;  %v826_v41 = vpop.f32.mrf.mxu2 }
 0x147   : > { %v880_v42 = vadd.f32 %v826_v41, %v702_v39 }
 0x148   : > { %v1172_v43 = vsel %vm1108_vm9, %v1076_v37, %v1140_v40 }
 0x149   : > { %v704_v44 = vpop.f32.mrf.mxu1  ;;  %1205 = vst.msk [vmem:[%s1849_s7 + $0xa0] sm:$0xff] %vm1184_vm4, %v1172_v43  ;;  %v987_v45 = vpop.f32.mrf.mxu3 }
 0x14a   : > { %v1041_v46 = vadd.f32 %v987_v45, %v880_v42 }
 0x14c   : > { %v1077_v47 = vadd.f32 %v1833_v28, %v1041_v46  ;;  %v524_v48 = vpop.f32.mrf.mxu0 }
 0x14d   : > { %v705_v49 = vadd.f32 %v704_v44, %v524_v48 }
 0x14e   : > { %vm1109_vm10 = vcmp.ge.f32.partialorder %v1077_v47, 0.0  ;;  %v1141_v50 = vmul.f32 0.2, %v1077_v47  ;;  %v829_v51 = vpop.f32.mrf.mxu2 }
 0x14f   : > { %v881_v52 = vadd.f32 %v829_v51, %v705_v49 }
 0x150   : > { %v1173_v53 = vsel %vm1109_vm10, %v1077_v47, %v1141_v50 }
 0x151   : > { %v707_v54 = vpop.f32.mrf.mxu1  ;;  %1206 = vst.msk [vmem:[%s1849_s7 + $0xa8] sm:$0xff] %vm1184_vm4, %v1173_v53  ;;  %v990_v55 = vpop.f32.mrf.mxu3 }
 0x152   : > { %v1042_v56 = vadd.f32 %v990_v55, %v881_v52 }
 0x154   : > { %v1078_v57 = vadd.f32 %v1833_v28, %v1042_v56  ;;  %v527_v58 = vpop.f32.mrf.mxu0 }
 0x155   : > { %v708_v59 = vadd.f32 %v707_v54, %v527_v58 }
 0x156   : > { %vm1110_vm11 = vcmp.ge.f32.partialorder %v1078_v57, 0.0  ;;  %v1142_v60 = vmul.f32 0.2, %v1078_v57  ;;  %v832_v61 = vpop.f32.mrf.mxu2 }
 0x157   : > { %v882_v62 = vadd.f32 %v832_v61, %v708_v59 }
 0x158   : > { %v1174_v63 = vsel %vm1110_vm11, %v1078_v57, %v1142_v60 }
 0x159   : > { %v710_v0 = vpop.f32.mrf.mxu1  ;;  %1207 = vst.msk [vmem:[%s1849_s7 + $0xb0] sm:$0xff] %vm1184_vm4, %v1174_v63  ;;  %v993_v1 = vpop.f32.mrf.mxu3 }
 0x15a   : > { %v1043_v2 = vadd.f32 %v993_v1, %v882_v62 }
 0x15c   : > { %v1079_v3 = vadd.f32 %v1833_v28, %v1043_v2  ;;  %v530_v4 = vpop.f32.mrf.mxu0 }
 0x15d   : > { %v711_v5 = vadd.f32 %v710_v0, %v530_v4 }
 0x15e   : > { %vm1111_vm12 = vcmp.ge.f32.partialorder %v1079_v3, 0.0  ;;  %v1143_v6 = vmul.f32 0.2, %v1079_v3  ;;  %v835_v7 = vpop.f32.mrf.mxu2 }
 0x15f   : > { %v883_v8 = vadd.f32 %v835_v7, %v711_v5 }
 0x160   : > { %v1175_v9 = vsel %vm1111_vm12, %v1079_v3, %v1143_v6 }
 0x161   : > { %v713_v10 = vpop.f32.mrf.mxu1  ;;  %1208 = vst.msk [vmem:[%s1849_s7 + $0xb8] sm:$0xff] %vm1184_vm4, %v1175_v9  ;;  %v996_v11 = vpop.f32.mrf.mxu3 }
 0x162   : > { %v1044_v12 = vadd.f32 %v996_v11, %v883_v8 }
 0x164   : > { %v1080_v13 = vadd.f32 %v1833_v28, %v1044_v12  ;;  %v533_v14 = vpop.f32.mrf.mxu0 }
 0x165   : > { %v714_v15 = vadd.f32 %v713_v10, %v533_v14 }
 0x166   : > { %vm1112_vm13 = vcmp.ge.f32.partialorder %v1080_v13, 0.0  ;;  %v1144_v16 = vmul.f32 0.2, %v1080_v13  ;;  %v838_v17 = vpop.f32.mrf.mxu2 }
 0x167   : > { %v884_v18 = vadd.f32 %v838_v17, %v714_v15 }
 0x168   : > { %v1176_v19 = vsel %vm1112_vm13, %v1080_v13, %v1144_v16 }
 0x169   : > { %v716_v20 = vpop.f32.mrf.mxu1  ;;  %1209 = vst.msk [vmem:[%s1849_s7 + $0xc0] sm:$0xff] %vm1184_vm4, %v1176_v19  ;;  %v999_v22 = vpop.f32.mrf.mxu3 }
 0x16a   : > { %v1045_v21 = vadd.f32 %v999_v22, %v884_v18 }
 0x16c   : > { %v1081_v23 = vadd.f32 %v1833_v28, %v1045_v21  ;;  %v536_v24 = vpop.f32.mrf.mxu0 }
 0x16d   : > { %v717_v25 = vadd.f32 %v716_v20, %v536_v24 }
 0x16e   : > { %vm1113_vm14 = vcmp.ge.f32.partialorder %v1081_v23, 0.0  ;;  %v1145_v26 = vmul.f32 0.2, %v1081_v23  ;;  %v841_v27 = vpop.f32.mrf.mxu2 }
 0x16f   : > { %v885_v29 = vadd.f32 %v841_v27, %v717_v25 }
 0x170   : > { %v1177_v30 = vsel %vm1113_vm14, %v1081_v23, %v1145_v26 }
 0x171   : > { %v719_v31 = vpop.f32.mrf.mxu1  ;;  %1210 = vst.msk [vmem:[%s1849_s7 + $0xc8] sm:$0xff] %vm1184_vm4, %v1177_v30  ;;  %v1002_v32 = vpop.f32.mrf.mxu3 }
 0x172   : > { %v1046_v33 = vadd.f32 %v1002_v32, %v885_v29 }
 0x174   : > { %v1082_v34 = vadd.f32 %v1833_v28, %v1046_v33  ;;  %v539_v35 = vpop.f32.mrf.mxu0 }
 0x175   : > { %v720_v36 = vadd.f32 %v719_v31, %v539_v35 }
 0x176   : > { %vm1114_vm15 = vcmp.ge.f32.partialorder %v1082_v34, 0.0  ;;  %v1146_v37 = vmul.f32 0.2, %v1082_v34  ;;  %v844_v38 = vpop.f32.mrf.mxu2 }
 0x177   : > { %v886_v39 = vadd.f32 %v844_v38, %v720_v36 }
 0x178   : > { %v1178_v40 = vsel %vm1114_vm15, %v1082_v34, %v1146_v37 }
 0x179   : > { %v722_v41 = vpop.f32.mrf.mxu1  ;;  %1211 = vst.msk [vmem:[%s1849_s7 + $0xd0] sm:$0xff] %vm1184_vm4, %v1178_v40  ;;  %v1005_v42 = vpop.f32.mrf.mxu3 }
 0x17a   : > { %v1047_v43 = vadd.f32 %v1005_v42, %v886_v39 }
 0x17c   : > { %v1083_v44 = vadd.f32 %v1833_v28, %v1047_v43  ;;  %v542_v45 = vpop.f32.mrf.mxu0 }
 0x17d   : > { %v723_v46 = vadd.f32 %v722_v41, %v542_v45 }
 0x17e   : > { %vm1115_vm0 = vcmp.ge.f32.partialorder %v1083_v44, 0.0  ;;  %v1147_v47 = vmul.f32 0.2, %v1083_v44  ;;  %v847_v48 = vpop.f32.mrf.mxu2 }
 0x17f   : > { %v887_v49 = vadd.f32 %v847_v48, %v723_v46 }
 0x180   : > { %v1179_v50 = vsel %vm1115_vm0, %v1083_v44, %v1147_v47 }
 0x181   : > { %v725_v51 = vpop.f32.mrf.mxu1  ;;  %1212 = vst.msk [vmem:[%s1849_s7 + $0xd8] sm:$0xff] %vm1184_vm4, %v1179_v50  ;;  %v1008_v52 = vpop.f32.mrf.mxu3 }
 0x182   : > { %v1048_v53 = vadd.f32 %v1008_v52, %v887_v49 }
 0x184   : > { %v1084_v54 = vadd.f32 %v1833_v28, %v1048_v53  ;;  %v545_v55 = vpop.f32.mrf.mxu0 }
 0x185   : > { %v726_v56 = vadd.f32 %v725_v51, %v545_v55 }
 0x186   : > { %vm1116_vm3 = vcmp.ge.f32.partialorder %v1084_v54, 0.0  ;;  %v1148_v57 = vmul.f32 0.2, %v1084_v54  ;;  %v850_v58 = vpop.f32.mrf.mxu2 }
 0x187   : > { %v888_v59 = vadd.f32 %v850_v58, %v726_v56 }
 0x188   : > { %v1180_v60 = vsel %vm1116_vm3, %v1084_v54, %v1148_v57 }
 0x189   : > { %v728_v61 = vpop.f32.mrf.mxu1  ;;  %1213 = vst.msk [vmem:[%s1849_s7 + $0xe0] sm:$0xff] %vm1184_vm4, %v1180_v60  ;;  %v1011_v62 = vpop.f32.mrf.mxu3 }
 0x18a   : > { %v1049_v63 = vadd.f32 %v1011_v62, %v888_v59 }
 0x18c   : > { %v1085_v0 = vadd.f32 %v1833_v28, %v1049_v63  ;;  %v548_v1 = vpop.f32.mrf.mxu0 }
 0x18d   : > { %v729_v2 = vadd.f32 %v728_v61, %v548_v1 }
 0x18e   : > { %vm1117_vm5 = vcmp.ge.f32.partialorder %v1085_v0, 0.0  ;;  %v1149_v3 = vmul.f32 0.2, %v1085_v0  ;;  %v853_v4 = vpop.f32.mrf.mxu2 }
 0x18f   : > { %v889_v5 = vadd.f32 %v853_v4, %v729_v2 }
 0x190   : > { %v1181_v6 = vsel %vm1117_vm5, %v1085_v0, %v1149_v3 }
 0x191   : > { %1214 = vst.msk [vmem:[%s1849_s7 + $0xe8] sm:$0xff] %vm1184_vm4, %v1181_v6  ;;  %v1014_v7 = vpop.f32.mrf.mxu3  ;;  %v731_v9 = vpop.f32.mrf.mxu1 }
 0x192   : > { %v1050_v8 = vadd.f32 %v1014_v7, %v889_v5 }
 0x194   : > { %v1086_v10 = vadd.f32 %v1833_v28, %v1050_v8  ;;  %v551_v11 = vpop.f32.mrf.mxu0 }
 0x195   : > { %v732_v12 = vadd.f32 %v731_v9, %v551_v11 }
 0x196   : > { %vm1118_vm2 = vcmp.ge.f32.partialorder %v1086_v10, 0.0  ;;  %v1150_v13 = vmul.f32 0.2, %v1086_v10  ;;  %v856_v14 = vpop.f32.mrf.mxu2 }
 0x197   : > { %v890_v15 = vadd.f32 %v856_v14, %v732_v12 }
 0x198   : > { %v1182_v16 = vsel %vm1118_vm2, %v1086_v10, %v1150_v13 }
 0x199   : > { %1215 = vst.msk [vmem:[%s1849_s7 + $0xf0] sm:$0xff] %vm1184_vm4, %v1182_v16  ;;  %v1017_v17 = vpop.f32.mrf.mxu3 }
 0x19a   : > { %v1051_v18 = vadd.f32 %v1017_v17, %v890_v15 }
 0x19c   : > { %v1087_v19 = vadd.f32 %v1833_v28, %v1051_v18 }
 0x19e   : > { %vm1119_vm1 = vcmp.ge.f32.partialorder %v1087_v19, 0.0  ;;  %v1151_v20 = vmul.f32 0.2, %v1087_v19 }
 0x1a0   : > { %v1183_v22 = vsel %vm1119_vm1, %v1087_v19, %v1151_v20 }
 0x1a1   : > { %1216 = vst.msk [vmem:[%s1849_s7 + $0xf8] sm:$0xff] %vm1184_vm4, %v1183_v22 }
 0x1a2   : > { %1548 = shalt.err (!%p1545_p5)
}
 0x1a3   : > { %s1601_s30 = smov 128   ;;  %s1602_s5 = smov 8  }
 0x1a4   : > { %1463 = dma.vmem_to_hbm [thread:$0]  (%p1663_p4), %s1234_s18, 4096, %s1236_s19, %s1218_s15, %s1601_s30, %s1601_s30, %s1602_s5  }
 0x1a5 PF: > { %p1469_p6 = scmp.ge.s32.totalorder %s1599_s17, 2  ;;  %s1250_s6 = sand.u32 1, %s1579_s12  }
 0x1a6   : > { %s1251_s7 = scalar_lea.sflag [#allocation3], %s1250_s6 }
 0x1a7   : > { %p1466_p7 = pnand %p1469_p6, %p1670_p8 }
 0x1a9   : > { %p1467_p9 = pneg %p1466_p7 }
 0x1ab   : > { %1574 = dma.done.wait (%p1467_p9), %s1251_s7, 4096  }
 0x1ac   : > { %1576 = vsyncadd (%p1467_p9), %s1251_s7, 4294963200  ;;  %s16_s17 = sadd.s32 1, %s1599_s17   ;;  %s2108_s12 = smov %s1583_s13 }
 0x1ad   : > { %p13_p10 = scmp.ge.s32.totalorder %s16_s17, 4   ;;  %s2109_s13 = smov %s1587_s14 }
 0x1ae   : > { %s2110_s14 = smov %s1676_s25  ;;  %s2111_s15 = smov %s1595_s16 }
 0x1af   : > { %s2112_s16 = smov %s2114_s20  ;;  %15 = sbr.rel (!%p13_p10) target bundleno = 4 (0x4), region = 71 }
 0x1b4   :  { %1257 = vsyncpa [#allocation3], 1 }
 0x1b5   :  { %1259 = vsyncpa [#allocation3 + $0x1], 1 }

</bundles_post_ra>
